<compile_context>
chip_gen: v6e
topology: v6e:2x2x1
jax: 0.10.0
libtpu: 0.0.40
codegen_flags: <defaults>
</compile_context>

<pallas_src>
import functools

import jax
import jax.numpy as jnp
from jax.experimental import pallas as pl
from jax.experimental.pallas import tpu as pltpu

EPS = 1e-4


def _bifpn_add2_kernel(w_ref, x0_ref, x1_ref, cw_ref, cb_ref, o_ref, *,
                       use_bf16_mxu):
    # w_ref:  SMEM (2,)          un-normalized fusion weights (nn.Parameter w)
    # x0_ref: VMEM (1, C1, TP)   input tile, pixels on the lane dim
    # x1_ref: VMEM (1, C1, TP)
    # cw_ref: VMEM (C2, C1)      1x1-conv weight
    # cb_ref: VMEM (C2, 1)       conv bias
    # o_ref:  VMEM (1, C2, TP)   output tile, pixels on the lane dim
    w0 = w_ref[0]
    w1 = w_ref[1]
    inv_den = 1.0 / (w0 + w1 + EPS)
    a0 = w0 * inv_den
    a1 = w1 * inv_den

    x0 = x0_ref[0].astype(jnp.float32)
    x1 = x1_ref[0].astype(jnp.float32)
    fused = a0 * x0 + a1 * x1                     # (C1, TP) f32
    act = fused * jax.nn.sigmoid(fused)           # SiLU

    # NOTE: when the last pixel tile is partial, its out-of-bounds lanes hold
    # garbage.  sigmoid/FMAs of garbage stay in those lanes (per-lane ops; the
    # conv contracts over channels, not pixels) and the partial store is
    # masked, so valid lanes are never contaminated.  Do not "fix" with a pad.

    c2, c1 = cw_ref.shape
    if c1 <= 16 and c2 <= 16:
        # Tiny channel counts: a (C2,C1)@(C1,TP) dot would use <0.2% of the
        # MXU and add push/pop latency; do C1 broadcast-FMAs on the VPU.
        cw = cw_ref[...]                          # (C2, C1)
        acc = cw[:, 0:1] * act[0:1, :]            # (C2, TP)
        for c in range(1, c1):
            acc = acc + cw[:, c:c + 1] * act[c:c + 1, :]
        out = acc
    else:
        lhs = cw_ref[...]
        rhs = act
        if use_bf16_mxu:
            # v5e's MXU is bf16-native; f32 operands decompose into multiple
            # passes.  Accumulation stays f32 via preferred_element_type.
            lhs = lhs.astype(jnp.bfloat16)
            rhs = rhs.astype(jnp.bfloat16)
        # 1x1 conv: (C2, C1) @ (C1, TP) -> (C2, TP); lane dim stays pixel-dense.
        out = jnp.dot(lhs, rhs, preferred_element_type=jnp.float32)

    o_ref[0] = (out + cb_ref[...]).astype(o_ref.dtype)


def _vmem_capacity_bytes():
    try:
        return int(pltpu.get_tpu_info().vmem_capacity_bytes)
    except Exception:
        return 64 << 20   # assume the tightest generation (v7x: 64 MiB / TC)


def _prefers_bf16_mxu():
    """True on v5e, where f32 MXU matmuls are multi-pass and much slower."""
    try:
        kind = jax.devices()[0].device_kind.lower()
    except Exception:
        return False
    return ("v5e" in kind) or ("v5 lite" in kind) or ("v5litepod" in kind)


def _pick_pixel_tile(hw, c1, c2, tile_pixels, in_bytes, out_bytes, n_batch,
                     vmem_cap, min_steps=2):
    """Pixel-tile (lane) size + number of pixel tiles.  Multiple of 128 when
    tiled; equal to HW when a single block covers everything (no masking)."""
    hw_128 = pl.cdiv(hw, 128) * 128
    c1_p = pl.cdiv(c1, 8) * 8
    c2_p = pl.cdiv(c2, 8) * 8
    if tile_pixels is None:
        # Double-buffered (x0 + x1 + out) blocks get ~1/3 of this generation's
        # VMEM (~21 MiB on v7x), capped at 40 MiB on v5e/v6e's 128 MiB, and at
        # 8192 lanes (diminishing returns beyond that).
        budget = max(8 << 20, min(vmem_cap // 3, 40 << 20))
        per_px = 2 * (2 * c1_p * in_bytes + c2_p * out_bytes)
        tile_pixels = (budget // per_px) // 128 * 128
        tile_pixels = max(128, min(8192, int(tile_pixels)))
    else:
        tile_pixels = max(128, (int(tile_pixels) // 128) * 128)

    tp = int(min(tile_pixels, hw_128))
    n_tiles = int(pl.cdiv(hw, tp))

    # v7x has 2 TensorCores and "parallel" axes shard grid steps across them:
    # make sure small levels still produce >= 2 steps when the pixel axis can
    # be split.
    # TODO(synk): levels with N == 1 and H*W <= 128 still yield a single grid
    # step (one v7x core idles); splitting the channel axis would fix that.
    if n_batch * n_tiles < min_steps and hw_128 >= min_steps * 128:
        tp = int(pl.cdiv(pl.cdiv(hw, min_steps), 128) * 128)
        n_tiles = int(pl.cdiv(hw, tp))

    if n_tiles == 1:
        tp = int(hw)   # single full-extent block: equals the array dim, no masking
    return tp, n_tiles


def bifpn_add2(x0, x1, w, conv_weight, conv_bias, *, tile_pixels=None,
               mxu_bf16=None):
    """BiFPN_Add2 forward.

    x0, x1: (N, C1, H, W) NCHW, float32 or bfloat16 (output matches input dtype).
    w: (2,) fusion weights.  conv_weight: (C2, C1, 1, 1).  conv_bias: (C2,).
    Returns (N, C2, H, W)."""
    N, C1, H, W = x0.shape
    C2 = conv_weight.shape[0]
    HW = H * W
    out_dtype = x0.dtype

    if mxu_bf16 is None:
        mxu_bf16 = _prefers_bf16_mxu()

    # Free, layout-preserving views (no transposes, no pads, no copies).
    x0r = x0.reshape(N, C1, HW)
    x1r = x1.reshape(N, C1, HW)
    wv = w.reshape(2).astype(jnp.float32)
    cw = conv_weight.reshape(C2, C1).astype(jnp.float32)
    cb = conv_bias.reshape(C2, 1).astype(jnp.float32)

    in_bytes = jnp.dtype(x0.dtype).itemsize
    out_bytes = jnp.dtype(out_dtype).itemsize
    vmem_cap = _vmem_capacity_bytes()

    tp, n_px_tiles = _pick_pixel_tile(HW, C1, C2, tile_pixels, in_bytes,
                                      out_bytes, N, vmem_cap)
    grid = (N, n_px_tiles)

    # VMEM limit: double-buffered x0/x1/out blocks + conv params + headroom,
    # clamped to 3/4 of this generation's physical VMEM.
    c1_p, c2_p = pl.cdiv(C1, 8) * 8, pl.cdiv(C2, 8) * 8
    tp_p = pl.cdiv(tp, 128) * 128
    need = (2 * (2 * c1_p * in_bytes + c2_p * out_bytes) * tp_p
            + 2 * (c2_p * c1_p + c2_p) * 4)
    vmem_limit = int(min(max(need + (4 << 20), 16 << 20), vmem_cap * 3 // 4))

    cost = pl.CostEstimate(
        flops=int(2 * N * HW * C1 * C2 + 6 * N * HW * C1 + N * HW * C2),
        transcendentals=int(N * HW * C1),
        bytes_accessed=int(N * HW * (2 * C1 * in_bytes + C2 * out_bytes)
                           + (C2 * C1 + C2) * 4),
    )

    kernel = functools.partial(_bifpn_add2_kernel, use_bf16_mxu=bool(mxu_bf16))

    out_flat = pl.pallas_call(
        kernel,
        out_shape=jax.ShapeDtypeStruct((N, C2, HW), out_dtype),
        grid_spec=pltpu.PrefetchScalarGridSpec(
            num_scalar_prefetch=0,
            grid=grid,
            in_specs=[
                pl.BlockSpec(memory_space=pltpu.SMEM),                # w (2,)
                pl.BlockSpec((1, C1, tp), lambda n, p: (n, 0, p)),    # x0 tile
                pl.BlockSpec((1, C1, tp), lambda n, p: (n, 0, p)),    # x1 tile
                pl.BlockSpec((C2, C1), lambda n, p: (0, 0)),          # conv W (const)
                pl.BlockSpec((C2, 1), lambda n, p: (0, 0)),           # conv b (const)
            ],
            out_specs=pl.BlockSpec((1, C2, tp), lambda n, p: (n, 0, p)),
        ),
        compiler_params=pltpu.CompilerParams(
            dimension_semantics=("parallel", "parallel"),
            vmem_limit_bytes=vmem_limit,
        ),
        cost_estimate=cost,
    )(wv, x0r, x1r, cw, cb)

    return out_flat.reshape(N, C2, H, W)


def _reference(x0, x1, w, conv_weight, conv_bias):
    wn = w / (jnp.sum(w) + EPS)
    fused = wn[0] * x0.astype(jnp.float32) + wn[1] * x1.astype(jnp.float32)
    act = fused * jax.nn.sigmoid(fused)
    cw2d = conv_weight.reshape(conv_weight.shape[0], conv_weight.shape[1])
    out = jnp.einsum("nchw,oc->nohw", act, cw2d.astype(jnp.float32))
    return out + conv_bias[None, :, None, None]


def _check(out, ref, atol, rtol, name):
    assert out.shape == ref.shape, f"shape mismatch ({name})"
    assert jnp.allclose(out.astype(jnp.float32), ref, atol=atol, rtol=rtol), \
        f"mismatch vs reference ({name})"


if __name__ == "__main__":
    key = jax.random.PRNGKey(0)
    k0, k1, k2, k3 = jax.random.split(key, 4)

    bf16_mxu = _prefers_bf16_mxu()
    mxu_tol = 2e-2 if bf16_mxu else 1e-5   # bf16 MXU operands on v5e only

    # 1) small-channel (VPU) path, aligned spatial size.
    N, C1, C2, H, W = 2, 4, 4, 16, 16
    x0 = jax.random.normal(k0, (N, C1, H, W), dtype=jnp.float32)
    x1 = jax.random.normal(k1, (N, C1, H, W), dtype=jnp.float32)
    w = jnp.ones((2,), dtype=jnp.float32)                    # nn.Parameter(ones(2))
    cwp = 0.1 * jax.random.normal(k2, (C2, C1, 1, 1), jnp.float32)
    cbp = 0.01 * jax.random.normal(k3, (C2,), jnp.float32)
    out = jax.block_until_ready(bifpn_add2(x0, x1, w, cwp, cbp))
    _check(out, _reference(x0, x1, w, cwp, cbp), 1e-5, 1e-5, "small-C")

    # 2) MXU path + the >=2-grid-step split for a single-batch level.
    N, C1, C2, H, W = 1, 32, 48, 16, 16
    x0 = jax.random.normal(k0, (N, C1, H, W), dtype=jnp.float32)
    x1 = jax.random.normal(k1, (N, C1, H, W), dtype=jnp.float32)
    cwp = 0.1 * jax.random.normal(k2, (C2, C1, 1, 1), jnp.float32)
    cbp = 0.01 * jax.random.normal(k3, (C2,), jnp.float32)
    out = jax.block_until_ready(bifpn_add2(x0, x1, w, cwp, cbp))
    _check(out, _reference(x0, x1, w, cwp, cbp), mxu_tol, mxu_tol, "mxu")

    # 3) ragged spatial size -> partial (masked) last pixel tile, no pad/slice.
    N, C1, C2, H, W = 1, 4, 4, 10, 13
    x0 = jax.random.normal(k0, (N, C1, H, W), dtype=jnp.float32)
    x1 = jax.random.normal(k1, (N, C1, H, W), dtype=jnp.float32)
    cwp = 0.1 * jax.random.normal(k2, (C2, C1, 1, 1), jnp.float32)
    cbp = 0.01 * jax.random.normal(k3, (C2,), jnp.float32)
    out = jax.block_until_ready(bifpn_add2(x0, x1, w, cwp, cbp))
    _check(out, _reference(x0, x1, w, cwp, cbp), 1e-5, 1e-5, "ragged")

    print("KERNEL_OK")
</pallas_src>

<mosaic_0001>
module attributes {stable_mosaic.version = 11 : i64} {
  func.func @_bifpn_add2_kernel(%arg0: i32, %arg1: i32, %arg2: memref<2xf32, #tpu.memory_space<smem>>, %arg3: memref<1x4x256xf32, #tpu.memory_space<vmem>>, %arg4: memref<1x4x256xf32, #tpu.memory_space<vmem>>, %arg5: memref<4x4xf32, #tpu.memory_space<vmem>>, %arg6: memref<4x1xf32, #tpu.memory_space<vmem>>, %arg7: memref<1x4x256xf32, #tpu.memory_space<vmem>>) attributes {dimension_semantics = [#tpu.dimension_semantics<parallel>, #tpu.dimension_semantics<parallel>], iteration_bounds = array<i64: 2, 1>, scalar_prefetch = 0 : i64, scratch_operands = 0 : i64, tpu.core_type = #tpu.core_type<tc>, window_params = [{transform_indices = @transform_0, window_bounds = array<i64: 2>}, {transform_indices = @transform_1, window_bounds = array<i64: 1, 4, 256>}, {transform_indices = @transform_2, window_bounds = array<i64: 1, 4, 256>}, {pipeline_mode = #tpu.pipeline_mode<synchronous>, transform_indices = @transform_3, window_bounds = array<i64: 4, 4>}, {pipeline_mode = #tpu.pipeline_mode<synchronous>, transform_indices = @transform_4, window_bounds = array<i64: 4, 1>}, {transform_indices = @transform_5, window_bounds = array<i64: 1, 4, 256>}]} {
    %c0 = arith.constant 0 : index
    %0 = memref.load %arg2[%c0] : memref<2xf32, #tpu.memory_space<smem>>
    %c1 = arith.constant 1 : index
    %1 = memref.load %arg2[%c1] : memref<2xf32, #tpu.memory_space<smem>>
    %2 = arith.addf %0, %1 : f32
    %cst = arith.constant 9.99999974E-5 : f32
    %3 = arith.addf %2, %cst : f32
    %cst_0 = arith.constant 1.000000e+00 : f32
    %4 = arith.divf %cst_0, %3 : f32
    %5 = arith.mulf %0, %4 : f32
    %6 = arith.mulf %1, %4 : f32
    %c0_1 = arith.constant 0 : index
    %c0_2 = arith.constant 0 : index
    %c0_3 = arith.constant 0 : index
    %7 = vector.load %arg3[%c0_1, %c0_2, %c0_3] : memref<1x4x256xf32, #tpu.memory_space<vmem>>, vector<1x4x256xf32>
    %8 = vector.shape_cast %7 : vector<1x4x256xf32> to vector<4x256xf32>
    %c0_4 = arith.constant 0 : index
    %c0_5 = arith.constant 0 : index
    %c0_6 = arith.constant 0 : index
    %9 = vector.load %arg4[%c0_4, %c0_5, %c0_6] : memref<1x4x256xf32, #tpu.memory_space<vmem>>, vector<1x4x256xf32>
    %10 = vector.shape_cast %9 : vector<1x4x256xf32> to vector<4x256xf32>
    %11 = vector.broadcast %5 : f32 to vector<4x256xf32>
    %12 = arith.mulf %11, %8 : vector<4x256xf32>
    %13 = vector.broadcast %6 : f32 to vector<4x256xf32>
    %14 = arith.mulf %13, %10 : vector<4x256xf32>
    %15 = arith.addf %12, %14 : vector<4x256xf32>
    %16 = arith.negf %15 : vector<4x256xf32>
    %17 = math.exp %16 : vector<4x256xf32>
    %cst_7 = arith.constant 1.000000e+00 : f32
    %18 = vector.broadcast %cst_7 : f32 to vector<4x256xf32>
    %19 = arith.addf %18, %17 : vector<4x256xf32>
    %20 = arith.divf %18, %19 : vector<4x256xf32>
    %21 = arith.mulf %15, %20 : vector<4x256xf32>
    %c0_8 = arith.constant 0 : index
    %c0_9 = arith.constant 0 : index
    %22 = vector.load %arg5[%c0_8, %c0_9] : memref<4x4xf32, #tpu.memory_space<vmem>>, vector<4x4xf32>
    %23 = vector.extract_strided_slice %22 {offsets = [0, 0], sizes = [4, 1], strides = [1, 1]} : vector<4x4xf32> to vector<4x1xf32>
    %24 = vector.extract_strided_slice %21 {offsets = [0, 0], sizes = [1, 256], strides = [1, 1]} : vector<4x256xf32> to vector<1x256xf32>
    %25 = vector.broadcast %23 : vector<4x1xf32> to vector<4x256xf32>
    %26 = vector.broadcast %24 : vector<1x256xf32> to vector<4x256xf32>
    %27 = arith.mulf %25, %26 : vector<4x256xf32>
    %28 = vector.extract_strided_slice %22 {offsets = [0, 1], sizes = [4, 1], strides = [1, 1]} : vector<4x4xf32> to vector<4x1xf32>
    %29 = vector.extract_strided_slice %21 {offsets = [1, 0], sizes = [1, 256], strides = [1, 1]} : vector<4x256xf32> to vector<1x256xf32>
    %30 = vector.broadcast %28 : vector<4x1xf32> to vector<4x256xf32>
    %31 = vector.broadcast %29 : vector<1x256xf32> to vector<4x256xf32>
    %32 = arith.mulf %30, %31 : vector<4x256xf32>
    %33 = arith.addf %27, %32 : vector<4x256xf32>
    %34 = vector.extract_strided_slice %22 {offsets = [0, 2], sizes = [4, 1], strides = [1, 1]} : vector<4x4xf32> to vector<4x1xf32>
    %35 = vector.extract_strided_slice %21 {offsets = [2, 0], sizes = [1, 256], strides = [1, 1]} : vector<4x256xf32> to vector<1x256xf32>
    %36 = vector.broadcast %34 : vector<4x1xf32> to vector<4x256xf32>
    %37 = vector.broadcast %35 : vector<1x256xf32> to vector<4x256xf32>
    %38 = arith.mulf %36, %37 : vector<4x256xf32>
    %39 = arith.addf %33, %38 : vector<4x256xf32>
    %40 = vector.extract_strided_slice %22 {offsets = [0, 3], sizes = [4, 1], strides = [1, 1]} : vector<4x4xf32> to vector<4x1xf32>
    %41 = vector.extract_strided_slice %21 {offsets = [3, 0], sizes = [1, 256], strides = [1, 1]} : vector<4x256xf32> to vector<1x256xf32>
    %42 = vector.broadcast %40 : vector<4x1xf32> to vector<4x256xf32>
    %43 = vector.broadcast %41 : vector<1x256xf32> to vector<4x256xf32>
    %44 = arith.mulf %42, %43 : vector<4x256xf32>
    %45 = arith.addf %39, %44 : vector<4x256xf32>
    %c0_10 = arith.constant 0 : index
    %c0_11 = arith.constant 0 : index
    %46 = vector.load %arg6[%c0_10, %c0_11] : memref<4x1xf32, #tpu.memory_space<vmem>>, vector<4x1xf32>
    %47 = vector.broadcast %46 : vector<4x1xf32> to vector<4x256xf32>
    %48 = arith.addf %45, %47 : vector<4x256xf32>
    %c0_12 = arith.constant 0 : index
    %c0_13 = arith.constant 0 : index
    %c0_14 = arith.constant 0 : index
    %49 = vector.load %arg7[%c0_12, %c0_13, %c0_14] : memref<1x4x256xf32, #tpu.memory_space<vmem>>, vector<1x4x256xf32>
    %50 = vector.shape_cast %49 : vector<1x4x256xf32> to vector<4x256xf32>
    %51 = vector.shape_cast %48 : vector<4x256xf32> to vector<1x4x256xf32>
    tpu.vector_store %arg7[%c0_12, %c0_13, %c0_14], %51 {strides = array<i32>} : memref<1x4x256xf32, #tpu.memory_space<vmem>>, vector<1x4x256xf32>,
    return
  }
  func.func @transform_0(%arg0: i32, %arg1: i32) -> i32 {
    %c0_i32 = arith.constant 0 : i32
    %c0_i32_0 = arith.constant 0 : i32
    return %c0_i32 : i32
  }
  func.func @transform_1(%arg0: i32, %arg1: i32) -> (i32, i32, i32) {
    %c0_i32 = arith.constant 0 : i32
    %c0_i32_0 = arith.constant 0 : i32
    return %arg0, %c0_i32, %arg1 : i32, i32, i32
  }
  func.func @transform_2(%arg0: i32, %arg1: i32) -> (i32, i32, i32) {
    %c0_i32 = arith.constant 0 : i32
    %c0_i32_0 = arith.constant 0 : i32
    return %arg0, %c0_i32, %arg1 : i32, i32, i32
  }
  func.func @transform_3(%arg0: i32, %arg1: i32) -> (i32, i32) {
    %c0_i32 = arith.constant 0 : i32
    %c0_i32_0 = arith.constant 0 : i32
    %c0_i32_1 = arith.constant 0 : i32
    return %c0_i32, %c0_i32_0 : i32, i32
  }
  func.func @transform_4(%arg0: i32, %arg1: i32) -> (i32, i32) {
    %c0_i32 = arith.constant 0 : i32
    %c0_i32_0 = arith.constant 0 : i32
    %c0_i32_1 = arith.constant 0 : i32
    return %c0_i32, %c0_i32_0 : i32, i32
  }
  func.func @transform_5(%arg0: i32, %arg1: i32) -> (i32, i32, i32) {
    %c0_i32 = arith.constant 0 : i32
    %c0_i32_0 = arith.constant 0 : i32
    return %arg0, %c0_i32, %arg1 : i32, i32, i32
  }
}

</mosaic_0001>

<bundles_post_ra>
// kernel: tpu_custom_call.1
= control target key start
LH: loop header
LB: loop body
LE: loop exit
PB: predicated region body
PF: predicated region fallthrough
CT: control target
= control target key end

     0   :  { %s1119_s0 = inlined_call_operand.vmem [shape: f32[2], index: 0, kind: input, shape index: {}]   ;;  %s1120_s1 = inlined_call_operand.hbm [shape: f32[2,4,256], index: 1, kind: input, shape index: {}]   ;;  %s1121_s2 = inlined_call_operand.hbm [shape: f32[2,4,256], index: 2, kind: input, shape index: {}]   ;;  %s1122_s3 = inlined_call_operand.vmem [shape: f32[4,4], index: 3, kind: input, shape index: {}]   ;;  %s1123_s4 = inlined_call_operand.vmem [shape: f32[4,1], index: 4, kind: input, shape index: {}]   ;;  %s1124_s5 = inlined_call_operand.hbm [shape: f32[2,4,256], index: 5, kind: output, shape index: {}]  }
   0x1   :  { %1127 = sst [smem:[#allocation15_spill]] %s1119_s0 }
   0x2   :  { %1128 = sst [smem:[#allocation16_spill]] %s1120_s1 }
   0x3   :  { %10 = vsyncpa [#allocation5], 0 }
   0x4   :  { %11 = vsyncpa [#allocation3], 0 }
   0x5   :  { %13 = vsyncpa [#allocation3 + $0x1], 0 }
   0x6   :  { %14 = vsyncpa [#allocation8], 0 }
   0x7   :  { %16 = vsyncpa [#allocation8 + $0x1], 0 }
   0x8   :  { %17 = vsyncpa [#allocation4], 0 }
   0x9   :  { %19 = vsyncpa [#allocation4 + $0x1], 0  ;;  %s919_s18 = smov 0   ;;  %s921_s19 = smov 0  }
   0xa   :  { %s923_s20 = smov 0   ;;  %s925_s21 = smov 0  }
   0xb   :  { %s927_s22 = smov 0   ;;  %s929_s23 = smov 0  }
   0xc LB: > { %s598_s24 = sadd.s32 4294967295, %s879_s23   ;;  %s599_s25 = sadd.s32 4294967294, %s879_s23   ;;  %s879_s23 = sphi %s929_s23, %s25_s23   ;;  %s875_s22 = sphi %s927_s22, %s1148_s22   ;;  %s871_s21 = sphi %s925_s21, %s1147_s21   ;;  %s867_s20 = sphi %s923_s20, %s1146_s20   ;;  %s863_s19 = sphi %s921_s19, %s1145_s19   ;;  %s859_s18 = sphi %s919_s18, %s1144_s18  }
   0xd   : > { %p80_p0 = scmp.ne.s32.totalorder %s863_s19, %s859_s18  ;;  %p953_p1 = scmp.eq.s32.totalorder %s598_s24, 0 }
   0xe   : > { %p957_p2 = scmp.eq.s32.totalorder %s598_s24, 1  ;;  %p182_p3 = scmp.eq.s32.totalorder %s599_s25, 1 }
   0xf   : > { %p963_p4 = por %p953_p1, %p80_p0  ;;  %p600_p5 = scmp.ge.s32.totalorder %s879_s23, 1 }
  0x10   : > { %p968_p6 = por %p182_p3, %p80_p0  ;;  %p189_p7 = scmp.lt.s32.totalorder %s879_s23, 3 }
  0x11   : > { %s1131_s28 = scalar_select %p963_p4, 1, 0 }
  0x12   : > { %s1132_s29 = scalar_select %p968_p6, 1, 0 }
  0x13   : > { %s1133_s0 = sld [smem:[#allocation15_spill]]  ;;  %p976_p8 = pnand %p600_p5, %p189_p7 }
  0x14   : > { %s37_s10 = sadd.s32 1, %s875_s22  ;;  %s67_s11 = sadd.s32 1, %s867_s20 }
  0x15   : > { %p636_p10 = pneg %p976_p8  ;;  %p39_p12 = scmp.ge.s32.totalorder %s37_s10, 2 }
  0x17   : > { %p985_p11 = pnand %p636_p10, %p953_p1 }
  0x19   : > { %s202_s7 = sshll.u32 %s1133_s0, 4  ;;  %p722_p0 = pneg %p985_p11  ;;  %s203_s7 = int_to_ptr.vmem [resolvable:$true] %s202_s7 }
  0x1a   : > { %s720_s12 = scalar_lea.vmem %s203_s7, 16  ;;  %p728_p7 = scmp.lt.s32.totalorder %s203_s7, %s203_s7 }
  0x1b   : > { %p721_p13 = scmp.ne.s32.totalorder %s203_s7, %s720_s12  ;;  %p729_p6 = scmp.lt.s32.totalorder %s720_s12, %s720_s12 }
  0x1d   : > { %p723_p3 = pnand %p722_p0, %p721_p13  ;;  %p730_p9 = por %p729_p6, %p728_p7 }
  0x1f   : > { %p724_p5 = pneg %p723_p3 }
  0x21   : > { %p731_p4 = pnand %p730_p9, %p724_p5 }
  0x23   : > { %734 = shalt.err (!%p731_p4)
}
  0x24   : > { %s881_s13 = smov [#allocation2]   ;;  %s1150_s10 = smov (%p39_p12, %s37_s10), 0 }
  0x25   : > { %639 = dma.vmem_to_smem (!%p985_p11), %s203_s7, 16, %s881_s13, [#allocation5]  }
  0x26   : > { %1136 = sst [smem:[#allocation14_spill]] %s1150_s10  ;;  %p74_p10 = scmp.ne.s32.totalorder %s867_s20, %s863_s19 }
  0x27   : > { %p75_p6 = scmp.eq.s32.totalorder %s879_s23, 0  ;;  %s62_s14 = ssub.s32 %s875_s22, %s1150_s10 }
  0x28   : > { %p652_p4 = scmp.lt.s32.totalorder %s879_s23, 2  ;;  %p65_p9 = scmp.eq.s32.totalorder %s62_s14, 0 }
  0x29   : > { %p76_p13 = por %p75_p6, %p74_p10  ;;  %p1005_p0 = por %p957_p2, %p74_p10 }
  0x2a   : > { %s1010_s16 = sand.u32 1, %s867_s20   ;;  %s621_s25 = sshll.u32 %s875_s22, 7 }
  0x2b   : > { %s1013_s17 = scalar_select %p65_p9, %s867_s20, %s67_s11  }
  0x2c   : > { %s603_s24 = sshll.u32 %s1010_s16, 3  ;;  %s1138_s1 = sld [smem:[#allocation16_spill]] }
  0x2d   : > { %s223_s9 = scalar_lea.vmem [#allocation6], %s603_s24  ;;  %p1020_p11 = pnand %p652_p4, %p76_p13 }
  0x2e   : > { %s233_s12 = sshll.u32 %s223_s9, 4  ;;  %s1027_s11 = scalar_lea.hbm %s1121_s2, %s621_s25  ;;  %s234_s12 = int_to_ptr.vmem [resolvable:$true] %s233_s12 }
  0x2f   : > { %s220_s0 = scalar_lea.sflag [#allocation3], %s1010_s16  ;;  %p737_p2 = pneg %p1020_p11 }
  0x30   : > { %s748_s10 = scalar_lea.vmem %s234_s12, 128  ;;  %s882_s30 = smov [#allocation6]  }
  0x31   : > { %p749_p12 = scmp.ne.s32.totalorder %s234_s12, %s748_s10  ;;  %s753_s6 = sshll.u32 %s882_s30, 4  ;;  %s754_s6 = int_to_ptr.vmem [resolvable:$false] %s753_s6 }
  0x32   : > { %s231_s7 = scalar_lea.hbm %s1138_s1, %s621_s25  ;;  %s755_s9 = scalar_lea.vmem %s754_s6, 256 }
  0x33   : > { %p751_p3 = pnand %p749_p12, %p737_p2  ;;  %p756_p7 = scmp.lt.s32.totalorder %s234_s12, %s754_s6 }
  0x34   : > { %p757_p10 = scmp.lt.s32.totalorder %s755_s9, %s748_s10 }
  0x35   : > { %p752_p5 = pneg %p751_p3 }
  0x36   : > { %p758_p6 = por %p757_p10, %p756_p7 }
  0x38   : > { %p759_p4 = pnand %p758_p6, %p752_p5 }
  0x3a   : > { %762 = shalt.err (!%p759_p4)
}
  0x3b   : > { %643 = dma.hbm_to_vmem [thread:$0]  (!%p1020_p11), %s231_s7, 128, %s234_s12, %s220_s0  }
  0x3c   : > { %s244_s25 = scalar_lea.vmem [#allocation7], %s603_s24  ;;  %s241_s14 = scalar_lea.sflag [#allocation8], %s1010_s16 }
  0x3d   : > { %s254_s13 = sshll.u32 %s244_s25, 4  ;;  %s883_s30 = smov [#allocation7]   ;;  %s255_s13 = int_to_ptr.vmem [resolvable:$true] %s254_s13 }
  0x3e   : > { %s776_s1 = scalar_lea.vmem %s255_s13, 128  ;;  %s781_s10 = sshll.u32 %s883_s30, 4  ;;  %s782_s10 = int_to_ptr.vmem [resolvable:$false] %s781_s10 }
  0x3f   : > { %p777_p9 = scmp.ne.s32.totalorder %s255_s13, %s776_s1  ;;  %s783_s6 = scalar_lea.vmem %s782_s10, 256 }
  0x40   : > { %p784_p3 = scmp.lt.s32.totalorder %s255_s13, %s782_s10  ;;  %p785_p5 = scmp.lt.s32.totalorder %s783_s6, %s776_s1 }
  0x41   : > { %p779_p13 = pnand %p777_p9, %p737_p2 }
  0x42   : > { %p786_p7 = por %p785_p5, %p784_p3 }
  0x43   : > { %p780_p12 = pneg %p779_p13 }
  0x45   : > { %p787_p10 = pnand %p786_p7, %p780_p12 }
  0x47   : > { %790 = shalt.err (!%p787_p10)
}
  0x48   : > { %646 = dma.hbm_to_vmem [thread:$0]  (!%p1020_p11), %s1027_s11, 128, %s255_s13, %s241_s14  }
  0x49   : > { %263 = sbr.rel (%p976_p8) target bundleno = 243 (0xf3), region = 40 }
  0x4e   : > { %842 = dma.done.wait (%p953_p1), [#allocation5], 16  }
  0x4f   : > { %844 = vsyncadd (%p953_p1), [#allocation5], 4294967280  ;;  %s1051_s0 = sand.u32 1, %s863_s19   ;;  %p1140_p11 = scmp.ne.s32.totalorder %s1131_s28, 0 }
  0x50   : > { %s1054_s1 = sshll.u32 %s1051_s0, 3  ;;  %s270_s16 = scalar_lea.sflag [#allocation3], %s1051_s0 }
  0x51   : > { %s273_s24 = scalar_lea.vmem [#allocation6], %s1054_s1 }
  0x52   : > { %846 = dma.done.wait (%p1140_p11), %s270_s16, 128  }
  0x53   : > { %848 = vsyncadd (%p1140_p11), %s270_s16, 4294967168  ;;  %s279_s26 = scalar_lea.sflag [#allocation8], %s1051_s0  ;;  %s282_s8 = scalar_lea.vmem [#allocation7], %s1054_s1 }
  0x54   : > { %850 = dma.done.wait (%p1140_p11), %s279_s26, 128  }
  0x55   : > { %852 = vsyncadd (%p1140_p11), %s279_s26, 4294967168 }
  0x56   : > { %287 = sfence }
  0x57   : > { %v341_v0 = vld [vmem:[%s1122_s3] sm:$0xf]  ;;  %v884_v1 = vmov 2   ;;  %v885_v2 = vmov 0   ;;  %s318_s27 = sld [smem:[#allocation2]]  ;;  %v886_v3 = vmov 3   ;;  %v348_v18 = vlaneseq }
  0x58   : > { %710 = vset.pattern.permute.xlu1 %v884_v1  ;;  %708 = vset.pattern.permute.xlu0 %v885_v2  ;;  %s614_s11 = sld [smem:[#allocation2 + $0x1]]  ;;  %v887_v4 = vmov 1   ;;  %v446_v5 = vld [vmem:[%s1123_s4] sm:$0xf]  ;;  %v328_v9 = vld [vmem:[%s282_s8] sm:$0xff]  ;;  %s623_s6 = sshll.u32 %s871_s21, 7 }
  0x59   : > { %395 = vperm.xlu1 %710, %v341_v0   ;;  %344 = vperm.xlu0 %708, %v341_v0   ;;  %v327_v8 = vld [vmem:[%s273_s24] sm:$0xff]  ;;  %v349_v19 = vshrl.u32 %v348_v18, 7  ;;  %s314_s16 = scalar_lea.vmem [#allocation9], %s1054_s1  ;;  %s474_s7 = scalar_lea.hbm %s1124_s5, %s623_s6 }
  0x5a   : > { %s476_s24 = sshll.u32 %s314_s16, 4  ;;  %s460_s12 = scalar_lea.sflag [#allocation4], %s1051_s0  ;;  %s477_s24 = int_to_ptr.vmem [resolvable:$true] %s476_s24 }
  0x5b   : > { %v350_v21 = vsub.s32 0, %v349_v19  ;;  %v354_v23 = vsub.s32 4, %v349_v19  ;;  %v374_v24 = vsub.s32 1, %v349_v19  ;;  %v378_v25 = vsub.s32 5, %v349_v19 }
  0x5c   : > { %v400_v26 = vsub.s32 2, %v349_v19  ;;  %v404_v27 = vsub.s32 6, %v349_v19  ;;  %v426_v28 = vsub.s32 3, %v349_v19  ;;  %v430_v29 = vsub.s32 7, %v349_v19 }
  0x5d   : > { %711 = vset.pattern.permute.xlu1 %v886_v3  ;;  %709 = vset.pattern.permute.xlu0 %v887_v4 }
  0x5e   : > { %421 = vperm.xlu1 %711, %v341_v0   ;;  %369 = vperm.xlu0 %709, %v341_v0   ;;  %s320_s28 = sadd.f32 %s614_s11, %s318_s27 }
  0x60   : > { %s321_s13 = sadd.f32 0.0001, %s320_s28 }
  0x62   : > { %712 = vset.pattern.permute.xlu1 %v885_v2  ;;  %713 = vset.pattern.permute.xlu0 %v885_v2  ;;  %v322_v6 = vstv %s321_s13 }
  0x63   : > { %449 = vperm.xlu1 %712, %v446_v5   ;;  %714 = vrcp.f32 %v322_v6 }
  0x70   : > { %v715_v7 = vpop.eup %714 }
  0x71   : > { %624 = vpush %v715_v7 }
  0xa2   : > { %s625_s14 = spop %624 }
  0xa3   : > { %s325_s30 = smul.f32 %s625_s14, %s318_s27  ;;  %s791_s27 = scalar_lea.vmem %s477_s24, 128 }
  0xa4   : > { %s326_s10 = smul.f32 %s625_s14, %s614_s11  ;;  %p792_p1 = scmp.ne.s32.totalorder %s477_s24, %s791_s27 }
  0xa5   : > { %v329_v10 = vstv %s325_s30  ;;  %s888_s11 = smov [#allocation9]  }
  0xa6   : > { %v330_v11 = vmul.f32 %v329_v10, %v327_v8  ;;  %v331_v12 = vstv %s326_s10  ;;  %p793_p8 = pnand %p792_p1, %p1005_p0  ;;  %s795_s28 = sshll.u32 %s888_s11, 4  ;;  %s796_s28 = int_to_ptr.vmem [resolvable:$false] %s795_s28 }
  0xa7   : > { %v332_v13 = vmul.f32 %v331_v12, %v328_v9  ;;  %s797_s21 = scalar_lea.vmem %s796_s28, 256  ;;  %p798_p6 = scmp.lt.s32.totalorder %s477_s24, %s796_s28 }
  0xa8   : > { %p794_p2 = pneg %p793_p8  ;;  %p799_p4 = scmp.lt.s32.totalorder %s797_s21, %s791_s27 }
  0xa9   : > { %v333_v14 = vadd.f32 %v332_v13, %v330_v11 }
  0xaa   : > { %p800_p9 = por %p799_p4, %p798_p6 }
  0xab   : > { %v615_v15 = vmul.f32 -1.442695, %v333_v14 }
  0xac   : > { %p801_p13 = pnand %p800_p9, %p794_p2 }
  0xad   : > { %716 = vpow2.f32 %v615_v15 }
  0xba   : > { %v717_v16 = vpop.eup %716 }
  0xbb   : > { %v337_v17 = vadd.f32 1.0, %v717_v16 }
  0xbd   : > { %718 = vrcp.f32 %v337_v17 }
  0xca   : > { %v719_v20 = vpop.eup %718 }
  0xcb   : > { %v340_v22 = vmul.f32 %v719_v20, %v333_v14 }
  0xcd   : > { %v351_v31 = vrot.slane %v340_v22, %v350_v21  ;;  %v355_v32 = vrot.slane %v340_v22, %v354_v23  ;;  %v375_v33 = vrot.slane %v340_v22, %v374_v24  ;;  %v379_v34 = vrot.slane %v340_v22, %v378_v25 }
  0xce   : > { %v401_v36 = vrot.slane %v340_v22, %v400_v26  ;;  %v405_v37 = vrot.slane %v340_v22, %v404_v27  ;;  %v427_v38 = vrot.slane %v340_v22, %v426_v28  ;;  %v431_v39 = vrot.slane %v340_v22, %v430_v29 }
  0xcf   : > { %v361_v40 = vrot.slane %v351_v31, %v350_v21  ;;  %v365_v41 = vrot.slane %v355_v32, %v350_v21  ;;  %v385_v42 = vrot.slane %v375_v33, %v374_v24  ;;  %v389_v43 = vrot.slane %v379_v34, %v374_v24 }
  0xd0   : > { %v411_v44 = vrot.slane %v401_v36, %v400_v26  ;;  %v415_v45 = vrot.slane %v405_v37, %v400_v26  ;;  %v437_v52 = vrot.slane %v427_v38, %v426_v28  ;;  %v441_v53 = vrot.slane %v431_v39, %v426_v28 }
  0xd4   : > { %v345_v30 = vpop.permute.xlu0 %344  ;;  %v396_v35 = vpop.permute.xlu1 %395 }
  0xd5   : > { %v366_v47 = vmul.f32 %v361_v40, %v345_v30  ;;  %v367_v48 = vmul.f32 %v365_v41, %v345_v30  ;;  %v416_v54 = vmul.f32 %v411_v44, %v396_v35  ;;  %v417_v55 = vmul.f32 %v415_v45, %v396_v35 }
  0xd9   : > { %v370_v46 = vpop.permute.xlu0 %369  ;;  %v422_v51 = vpop.permute.xlu1 %421 }
  0xda   : > { %v390_v49 = vmul.f32 %v385_v42, %v370_v46  ;;  %v391_v50 = vmul.f32 %v389_v43, %v370_v46  ;;  %v442_v58 = vmul.f32 %v437_v52, %v422_v51  ;;  %v443_v59 = vmul.f32 %v441_v53, %v422_v51 }
  0xdc   : > { %v392_v56 = vadd.f32 %v390_v49, %v366_v47  ;;  %v393_v57 = vadd.f32 %v391_v50, %v367_v48 }
  0xde   : > { %v418_v60 = vadd.f32 %v416_v54, %v392_v56  ;;  %v419_v61 = vadd.f32 %v417_v55, %v393_v57  ;;  %v450_v62 = vpop.permute.xlu1 %449 }
  0xe0   : > { %v444_v63 = vadd.f32 %v442_v58, %v418_v60  ;;  %v445_v0 = vadd.f32 %v443_v59, %v419_v61 }
  0xe2   : > { %v452_v1 = vadd.f32 %v450_v62, %v444_v63  ;;  %v453_v2 = vadd.f32 %v450_v62, %v445_v0 }
  0xe4   : > { %v456_v3 = vcombine.low %v452_v1, %v453_v2 }
  0xe6   : > { %458 = vst [vmem:[%s314_s16] sm:$0xff] %v456_v3 }
  0xe7   : > { %804 = shalt.err (!%p801_p13)
}
  0xe8   : > { %s805_s1 = scalar_lea.hbm %s474_s7, 128  ;;  %s809_s25 = scalar_lea.hbm %s1124_s5, 256 }
  0xe9   : > { %p806_p12 = scmp.ne.s32.totalorder %s474_s7, %s805_s1  ;;  %p810_p7 = scmp.lt.s32.totalorder %s474_s7, %s1124_s5 }
  0xea   : > { %p811_p10 = scmp.lt.s32.totalorder %s809_s25, %s805_s1 }
  0xeb   : > { %p807_p3 = pnand %p806_p12, %p1005_p0 }
  0xec   : > { %p812_p11 = por %p811_p10, %p810_p7 }
  0xed   : > { %p808_p5 = pneg %p807_p3 }
  0xef   : > { %p813_p1 = pnand %p812_p11, %p808_p5 }
  0xf1   : > { %816 = shalt.err (!%p813_p1)
}
  0xf2   : > { %634 = dma.vmem_to_hbm [thread:$0]  (%p1005_p0), %s477_s24, 128, %s474_s7, %s460_s12  }
  0xf3 PF: > { %s488_s30 = sand.u32 1, %s859_s18   ;;  %p1141_p8 = scmp.ne.s32.totalorder %s1132_s29, 0 }
  0xf4   : > { %p1142_p2 = scmp.ge.s32.totalorder %s879_s23, 2  ;;  %s489_s10 = scalar_lea.sflag [#allocation4], %s488_s30 }
  0xf6   : > { %p648_p6 = pnand %p1142_p2, %p1141_p8 }
  0xf8   : > { %p649_p4 = pneg %p648_p6 }
  0xfa   : > { %854 = dma.done.wait (%p649_p4), %s489_s10, 128  }
  0xfb   : > { %856 = vsyncadd (%p649_p4), %s489_s10, 4294967168  ;;  %s25_s23 = sadd.s32 1, %s879_s23   ;;  %s1143_s15 = sld [smem:[#allocation14_spill]] }
  0xfc   : > { %p22_p9 = scmp.ge.s32.totalorder %s25_s23, 4   ;;  %s1144_s18 = smov %s863_s19 }
  0xfd   : > { %s1145_s19 = smov %s867_s20  ;;  %s1146_s20 = smov %s1013_s17 }
  0xfe   : > { %s1147_s21 = smov %s875_s22  ;;  %24 = sbr.rel (!%p22_p9) target bundleno = 12 (0xc), region = 103 }
 0x101   : > { %s1148_s22 = smov %s1143_s15 }
 0x103   :  { %494 = vsyncpa [#allocation3], 1 }
 0x104   :  { %496 = vsyncpa [#allocation3 + $0x1], 1 }
 0x105   :  { %497 = vsyncpa [#allocation8], 1 }
 0x106   :  { %499 = vsyncpa [#allocation8 + $0x1], 1 }
 0x107   :  { %500 = vsyncpa [#allocation4], 1 }
 0x108   :  { %502 = vsyncpa [#allocation4 + $0x1], 1 }
 0x109   :  { %503 = vsyncpa [#allocation5], 1 }
 0x10a   :  { %505 = vsyncpa [#allocation5 + $0x1], 1 }

</bundles_post_ra>
